<compile_context>
chip_gen: v5e
topology: v5e:2x2
jax: 0.10.0
libtpu: 0.0.40
codegen_flags: <defaults>
</compile_context>

<pallas_src>
import functools

import jax
import jax.numpy as jnp
from jax.experimental import pallas as pl
from jax.experimental.pallas import tpu as pltpu


def _round_up(x, m):
    return ((x + m - 1) // m) * m


# ------------------------------- fused kernel ------------------------------- #

def _fused_fftnet_kernel(*args, Ks, tile_rows, fuse_taps):
    """One grid step == (batch element b, time tile t); runs all FFT layers + fc.

    args = (x_ref,
            w11_0, w12_0, b1_0, w2_0, b2_0,                      # layer 0 (C_in == 1)
            per-layer params for layers 1..L-1:
                fuse_taps:      wcat_i, b1_i, w2_i, b2_i
                two-dot (v5e):  w11_i, w12_i, b1_i, w2_i, b2_i
            fc_w, fc_b,
            o_ref, act_scratch)
    """
    n_layers = len(Ks)
    R = sum(Ks)
    x_ref = args[0]
    o_ref = args[-2]
    act_ref = args[-1]
    wr = args[1:-2]

    t = pl.program_id(1)
    start = pl.multiple_of(t * tile_rows, 8)        # tile_rows is a multiple of 8

    # ---- layer 0: C_in == 1 -> VPU broadcast outer-product (skip the MXU) ----
    w11_r, w12_r, b1_r, w2_r, b2_r = wr[0:5]
    idx = 5
    K = Ks[0]
    n = tile_rows + R                                # input rows for this tile (halo)
    n_out = n - K
    x1 = x_ref[0, pl.ds(start, n_out), :]            # (n_out, 1) f32
    x2 = x_ref[0, pl.ds(start + K, n_out), :]        # shifted tap
    z = x1 * w11_r[...] + x2 * w12_r[...] + b1_r[...]         # (n_out, Hp), pure VPU
    h = jnp.maximum(z, 0.0).astype(jnp.bfloat16)
    a = jnp.maximum(
        jnp.dot(h, w2_r[...], preferred_element_type=jnp.float32) + b2_r[...], 0.0)
    n = n_out

    # ---- layers 1..L-1 ----
    for i in range(1, n_layers):
        K = Ks[i]
        n_out = n - K
        # Stage activation once; only the K-shifted tap is re-read from VMEM.
        act_ref[pl.ds(0, n), :] = a
        x1b = a[:n_out].astype(jnp.bfloat16)                     # live value, no reload
        x2b = act_ref[pl.ds(K, n_out), :].astype(jnp.bfloat16)   # row-offset tap load
        if fuse_taps:
            # One 2*Hp-deep contraction (fills the 256-deep MXU on v6e/v7x).
            wcat_r, b1_r, w2_r, b2_r = wr[idx:idx + 4]
            idx += 4
            xa = jnp.concatenate([x1b, x2b], axis=-1)            # (n_out, 2*Hp) bf16
            z = (jnp.dot(xa, wcat_r[...], preferred_element_type=jnp.float32)
                 + b1_r[...])
        else:
            # v5e: two Hp-deep dots (MXU is 128-deep anyway; avoids the concat copy).
            w11_r, w12_r, b1_r, w2_r, b2_r = wr[idx:idx + 5]
            idx += 5
            z = (jnp.dot(x1b, w11_r[...], preferred_element_type=jnp.float32)
                 + jnp.dot(x2b, w12_r[...], preferred_element_type=jnp.float32)
                 + b1_r[...])
        h = jnp.maximum(z, 0.0).astype(jnp.bfloat16)
        a = jnp.maximum(
            jnp.dot(h, w2_r[...], preferred_element_type=jnp.float32) + b2_r[...], 0.0)
        n = n_out

    # ---- final Linear, fused (a now has exactly tile_rows rows) ----
    fc_w_r, fc_b_r = wr[idx:idx + 2]
    y = jnp.dot(a.astype(jnp.bfloat16), fc_w_r[...],
                preferred_element_type=jnp.float32) + fc_b_r[...]
    o_ref[0, :, :] = y.astype(o_ref.dtype)           # lane-dense bf16 store


# ------------------------------ model wrapper ------------------------------- #

def fftnet_model_forward(x_nct, packed, *, time_tile=512):
    """x_nct: (B, 1, T) float32 (PyTorch layout). Returns (B, T - R, out_ch) bf16."""
    B, c_in, T_in = x_nct.shape
    assert c_in == 1, "FFTNetModel forward takes a single-channel waveform"
    layers = packed["layers"]
    fc = packed["fc"]
    Hp, Op = packed["Hp"], packed["Op"]
    out_channels = packed["out_channels"]
    fuse_taps = packed["fuse_taps"]
    Ks = tuple(p["K"] for p in layers)
    R = sum(Ks)
    T_final = T_in - R
    assert T_final > 0, "input shorter than the receptive field"

    # ---- time tiling with a receptive-field halo per tile ----
    tile_rows = min(_round_up(time_tile, 8), _round_up(T_final, 8))
    n_t = pl.cdiv(T_final, tile_rows)
    T_out_pad = n_t * tile_rows
    T_in_pad = _round_up(T_out_pad + R, 8)

    x = jnp.transpose(x_nct, (0, 2, 1)).astype(jnp.float32)     # (B, T, 1) channels-last
    x = jnp.pad(x, ((0, 0), (0, T_in_pad - T_in), (0, 0)))      # zero halo/tail padding

    n_scr = max(tile_rows + R - Ks[0], 8) if len(Ks) > 1 else 8
    T_scratch = _round_up(n_scr, 8)

    operands = [x]
    in_specs = [pl.BlockSpec((1, T_in_pad, 1), lambda b, t: (b, 0, 0))]

    def const_spec(arr):
        nd = arr.ndim
        # Block index never changes over the grid -> single buffer (saves VMEM).
        return pl.BlockSpec(arr.shape, lambda b, t, _nd=nd: (0,) * _nd,
                            pipeline_mode=pl.Buffered(1))

    p0 = layers[0]
    for name in ("w11", "w12", "b1", "w2", "b2"):
        operands.append(p0[name])
        in_specs.append(const_spec(p0[name]))
    for p in layers[1:]:
        names = ("wcat", "b1", "w2", "b2") if fuse_taps else ("w11", "w12", "b1", "w2", "b2")
        for name in names:
            operands.append(p[name])
            in_specs.append(const_spec(p[name]))
    operands += [fc["w"], fc["b"]]
    in_specs += [const_spec(fc["w"]), const_spec(fc["b"])]

    # ---- VMEM budget (explicit; capped below v7x's 64 MiB per TensorCore) ----
    weight_bytes = sum(int(a.size) * a.dtype.itemsize for a in operands[1:])
    x_bytes = int(x.size) * x.dtype.itemsize
    out_bytes = B * T_out_pad * Op * 2                                  # bf16 output
    vmem_est = (weight_bytes                       # constants, single-buffered
                + 2 * T_in_pad * 1 * 4             # x block, double-buffered
                + 2 * tile_rows * Op * 2           # output block, double-buffered
                + T_scratch * Hp * 4)              # activation scratch
    vmem_limit = int(min(max(2 * vmem_est, 8 << 20), 48 << 20))

    # ---- advisory cost estimate for the XLA scheduler ----
    flops = 0
    rows = tile_rows + R
    for i, K in enumerate(Ks):
        rows -= K
        cin = 2 if i == 0 else 2 * Hp
        flops += 2 * rows * cin * Hp               # conv1_1 + conv1_2 (fused taps)
        flops += 2 * rows * Hp * Hp                # conv2
    flops += 2 * tile_rows * Hp * Op               # fc
    flops *= B * n_t
    cost = pl.CostEstimate(flops=flops, transcendentals=0,
                           bytes_accessed=x_bytes + weight_bytes + out_bytes)

    kernel = functools.partial(_fused_fftnet_kernel, Ks=Ks, tile_rows=tile_rows,
                               fuse_taps=fuse_taps)

    y_pad = pl.pallas_call(
        kernel,
        out_shape=jax.ShapeDtypeStruct((B, T_out_pad, Op), jnp.bfloat16),
        grid=(B, n_t),
        in_specs=in_specs,
        out_specs=pl.BlockSpec((1, tile_rows, Op), lambda b, t: (b, t, 0)),
        scratch_shapes=[pltpu.VMEM((T_scratch, Hp), jnp.float32)],
        compiler_params=pltpu.CompilerParams(
            dimension_semantics=("parallel", "parallel"),
            vmem_limit_bytes=vmem_limit),
        cost_estimate=cost,
    )(*operands)
    return y_pad[:, :T_final, :out_channels]        # strip time + lane padding


# --------------------------- parameter construction ------------------------- #

def init_raw_params(key, hid_channels, out_channels, n_layers):
    """Synthetic f32 parameters mirroring FFTNetModel.__init__ shapes.

    Conv weights are stored already transposed to (C_in, C_out) so the channels-last
    forward is `x @ W`. conv1_* weights use std = sqrt(0.5 / C_in) with zero bias,
    matching FFTNet.init_weights; conv2 / fc get small deterministic normals.
    """
    layers = []
    for layer_idx in range(n_layers):
        layer_id = n_layers - layer_idx
        K = 2 ** (layer_id - 1)
        in_ch = 1 if layer_idx == 0 else hid_channels
        std = (0.5 / in_ch) ** 0.5
        key, k1, k2, k3, k4 = jax.random.split(key, 5)
        layers.append(dict(
            K=K,
            w11=jax.random.normal(k1, (in_ch, hid_channels), jnp.float32) * std,
            w12=jax.random.normal(k2, (in_ch, hid_channels), jnp.float32) * std,
            b1=jnp.zeros((hid_channels,), jnp.float32),   # b1_1 + b1_2, both zero-init
            w2=jax.random.normal(k3, (hid_channels, hid_channels), jnp.float32) * 0.05,
            b2=jax.random.normal(k4, (hid_channels,), jnp.float32) * 0.05,
        ))
    key, kf1, kf2 = jax.random.split(key, 3)
    fc = dict(
        w=jax.random.normal(kf1, (hid_channels, out_channels), jnp.float32) * 0.05,
        b=jax.random.normal(kf2, (out_channels,), jnp.float32) * 0.05,
    )
    return layers, fc


def _pad2d(a, rows, cols):
    return jnp.zeros((rows, cols), a.dtype).at[: a.shape[0], : a.shape[1]].set(a)


def _pad_row(v, cols):
    return jnp.zeros((1, cols), v.dtype).at[0, : v.shape[0]].set(v)


def pack_params(raw_layers, raw_fc, hid_channels, out_channels, *, fuse_taps=True):
    """Pad channel dims to a lane-dense multiple of 128 and cast MXU weights to bf16.

    fuse_taps=True stacks [W11; W12] for a single 2*Hp-deep contraction (v6e/v7x);
    fuse_taps=False keeps them separate for the two-dot v5e path.
    TODO(synk): int8 (v5e/v6e) / fp8 (v7x) weights if layer matmuls become MXU-bound.
    """
    Hp = max(128, _round_up(hid_channels, 128))
    Op = max(128, _round_up(out_channels, 128))
    layers = []
    for i, p in enumerate(raw_layers):
        entry = dict(
            K=p["K"],
            b1=_pad_row(p["b1"], Hp),
            w2=_pad2d(p["w2"], Hp, Hp).astype(jnp.bfloat16),
            b2=_pad_row(p["b2"], Hp),
        )
        if i == 0:
            # C_in == 1 -> keep the two 1-row tap weights in f32 for the VPU path.
            entry["w11"] = _pad_row(p["w11"][0], Hp)
            entry["w12"] = _pad_row(p["w12"][0], Hp)
        elif fuse_taps:
            w11p = _pad2d(p["w11"], Hp, Hp)
            w12p = _pad2d(p["w12"], Hp, Hp)
            entry["wcat"] = jnp.concatenate([w11p, w12p], axis=0).astype(jnp.bfloat16)
        else:
            entry["w11"] = _pad2d(p["w11"], Hp, Hp).astype(jnp.bfloat16)
            entry["w12"] = _pad2d(p["w12"], Hp, Hp).astype(jnp.bfloat16)
        layers.append(entry)
    fc = dict(
        w=_pad2d(raw_fc["w"], Hp, Op).astype(jnp.bfloat16),
        b=_pad_row(raw_fc["b"], Op),
    )
    return dict(layers=layers, fc=fc, Hp=Hp, Op=Op,
                out_channels=out_channels, fuse_taps=fuse_taps)


# ------------------------------ pure-jnp reference --------------------------- #

def fftnet_model_reference(x_nct, raw_layers, raw_fc):
    """Replicates the PyTorch FFTNetModel.forward semantics in plain f32 jnp."""
    out = jnp.transpose(x_nct, (0, 2, 1)).astype(jnp.float32)
    for p in raw_layers:
        K = p["K"]
        x1 = out[:, : out.shape[1] - K, :]
        x2 = out[:, K:, :]
        z = x1 @ p["w11"] + x2 @ p["w12"] + p["b1"]
        h = jnp.maximum(z, 0.0)
        out = jnp.maximum(h @ p["w2"] + p["b2"], 0.0)
    return out @ raw_fc["w"] + raw_fc["b"]


# ------------------------------------- main ---------------------------------- #

if __name__ == "__main__":
    B = 2
    T = 16
    hid_channels = 32
    out_channels = 32
    n_layers = 3          # receptive field 8 -> output time = T - (2**3 - 1) = 9

    key = jax.random.PRNGKey(0)
    key, kx, kp = jax.random.split(key, 3)
    x = jax.random.normal(kx, (B, 1, T), jnp.float32)    # batch x 1 x time (PyTorch layout)

    # v5e: two Hp-deep dots per layer; v6e/v7x: one fused 2*Hp-deep contraction.
    try:
        fuse_taps = "v5" not in jax.devices()[0].device_kind.lower()
    except Exception:  # pragma: no cover - defensive
        fuse_taps = True

    raw_layers, raw_fc = init_raw_params(kp, hid_channels, out_channels, n_layers)
    packed = pack_params(raw_layers, raw_fc, hid_channels, out_channels,
                         fuse_taps=fuse_taps)

    y = fftnet_model_forward(x, packed, time_tile=512)
    y = jax.block_until_ready(y)

    y_ref = fftnet_model_reference(x, raw_layers, raw_fc)
    assert y.shape == (B, T - (2 ** n_layers - 1), out_channels), y.shape
    # Kernel uses bf16 matmul operands (f32 accumulation) and a bf16 output store, so
    # compare against the f32 reference with a correspondingly relaxed tolerance.
    yf = y.astype(jnp.float32)
    max_err = float(jnp.max(jnp.abs(yf - y_ref)))
    assert jnp.allclose(yf, y_ref, atol=2e-2, rtol=2e-2), max_err

    print("KERNEL_OK")
</pallas_src>

<mosaic_0001>
module attributes {stable_mosaic.version = 11 : i64} {
  func.func @_fused_fftnet_kernel(%arg0: i32, %arg1: i32, %arg2: memref<1x24x1xf32, #tpu.memory_space<vmem>>, %arg3: memref<1x128xf32, #tpu.memory_space<vmem>>, %arg4: memref<1x128xf32, #tpu.memory_space<vmem>>, %arg5: memref<1x128xf32, #tpu.memory_space<vmem>>, %arg6: memref<128x128xbf16, #tpu.memory_space<vmem>>, %arg7: memref<1x128xf32, #tpu.memory_space<vmem>>, %arg8: memref<256x128xbf16, #tpu.memory_space<vmem>>, %arg9: memref<1x128xf32, #tpu.memory_space<vmem>>, %arg10: memref<128x128xbf16, #tpu.memory_space<vmem>>, %arg11: memref<1x128xf32, #tpu.memory_space<vmem>>, %arg12: memref<256x128xbf16, #tpu.memory_space<vmem>>, %arg13: memref<1x128xf32, #tpu.memory_space<vmem>>, %arg14: memref<128x128xbf16, #tpu.memory_space<vmem>>, %arg15: memref<1x128xf32, #tpu.memory_space<vmem>>, %arg16: memref<128x128xbf16, #tpu.memory_space<vmem>>, %arg17: memref<1x128xf32, #tpu.memory_space<vmem>>, %arg18: memref<1x16x128xbf16, #tpu.memory_space<vmem>>, %arg19: memref<24x128xf32, #tpu.memory_space<vmem>>) attributes {dimension_semantics = [#tpu.dimension_semantics<parallel>, #tpu.dimension_semantics<parallel>], iteration_bounds = array<i64: 2, 1>, scalar_prefetch = 0 : i64, scratch_operands = 1 : i64, tpu.core_type = #tpu.core_type<tc>, window_params = [{transform_indices = @transform_0, window_bounds = array<i64: 1, 24, 1>}, {pipeline_mode = #tpu.pipeline_mode<synchronous>, transform_indices = @transform_1, window_bounds = array<i64: 1, 128>}, {pipeline_mode = #tpu.pipeline_mode<synchronous>, transform_indices = @transform_2, window_bounds = array<i64: 1, 128>}, {pipeline_mode = #tpu.pipeline_mode<synchronous>, transform_indices = @transform_3, window_bounds = array<i64: 1, 128>}, {pipeline_mode = #tpu.pipeline_mode<synchronous>, transform_indices = @transform_4, window_bounds = array<i64: 128, 128>}, {pipeline_mode = #tpu.pipeline_mode<synchronous>, transform_indices = @transform_5, window_bounds = array<i64: 1, 128>}, {pipeline_mode = #tpu.pipeline_mode<synchronous>, transform_indices = @transform_6, window_bounds = array<i64: 256, 128>}, {pipeline_mode = #tpu.pipeline_mode<synchronous>, transform_indices = @transform_7, window_bounds = array<i64: 1, 128>}, {pipeline_mode = #tpu.pipeline_mode<synchronous>, transform_indices = @transform_8, window_bounds = array<i64: 128, 128>}, {pipeline_mode = #tpu.pipeline_mode<synchronous>, transform_indices = @transform_9, window_bounds = array<i64: 1, 128>}, {pipeline_mode = #tpu.pipeline_mode<synchronous>, transform_indices = @transform_10, window_bounds = array<i64: 256, 128>}, {pipeline_mode = #tpu.pipeline_mode<synchronous>, transform_indices = @transform_11, window_bounds = array<i64: 1, 128>}, {pipeline_mode = #tpu.pipeline_mode<synchronous>, transform_indices = @transform_12, window_bounds = array<i64: 128, 128>}, {pipeline_mode = #tpu.pipeline_mode<synchronous>, transform_indices = @transform_13, window_bounds = array<i64: 1, 128>}, {pipeline_mode = #tpu.pipeline_mode<synchronous>, transform_indices = @transform_14, window_bounds = array<i64: 128, 128>}, {pipeline_mode = #tpu.pipeline_mode<synchronous>, transform_indices = @transform_15, window_bounds = array<i64: 1, 128>}, {transform_indices = @transform_16, window_bounds = array<i64: 1, 16, 128>}]} {
    %c16_i32 = arith.constant 16 : i32
    %0 = arith.muli %arg1, %c16_i32 : i32
    %1 = tpu.assume_multiple %0, 8 : i32
    %c0 = arith.constant 0 : index
    %2 = arith.index_cast %1 : i32 to index
    %c0_0 = arith.constant 0 : index
    %3 = vector.load %arg2[%c0, %2, %c0_0] : memref<1x24x1xf32, #tpu.memory_space<vmem>>, vector<1x19x1xf32>
    %4 = vector.shape_cast %3 : vector<1x19x1xf32> to vector<19x1xf32>
    %c4_i32 = arith.constant 4 : i32
    %5 = arith.addi %1, %c4_i32 : i32
    %c0_1 = arith.constant 0 : index
    %6 = arith.index_cast %5 : i32 to index
    %c0_2 = arith.constant 0 : index
    %7 = vector.load %arg2[%c0_1, %6, %c0_2] : memref<1x24x1xf32, #tpu.memory_space<vmem>>, vector<1x19x1xf32>
    %8 = vector.shape_cast %7 : vector<1x19x1xf32> to vector<19x1xf32>
    %c0_3 = arith.constant 0 : index
    %c0_4 = arith.constant 0 : index
    %9 = vector.load %arg3[%c0_3, %c0_4] : memref<1x128xf32, #tpu.memory_space<vmem>>, vector<1x128xf32>
    %10 = vector.broadcast %4 : vector<19x1xf32> to vector<19x128xf32>
    %11 = vector.broadcast %9 : vector<1x128xf32> to vector<19x128xf32>
    %12 = arith.mulf %10, %11 : vector<19x128xf32>
    %c0_5 = arith.constant 0 : index
    %c0_6 = arith.constant 0 : index
    %13 = vector.load %arg4[%c0_5, %c0_6] : memref<1x128xf32, #tpu.memory_space<vmem>>, vector<1x128xf32>
    %14 = vector.broadcast %8 : vector<19x1xf32> to vector<19x128xf32>
    %15 = vector.broadcast %13 : vector<1x128xf32> to vector<19x128xf32>
    %16 = arith.mulf %14, %15 : vector<19x128xf32>
    %17 = arith.addf %12, %16 : vector<19x128xf32>
    %c0_7 = arith.constant 0 : index
    %c0_8 = arith.constant 0 : index
    %18 = vector.load %arg5[%c0_7, %c0_8] : memref<1x128xf32, #tpu.memory_space<vmem>>, vector<1x128xf32>
    %19 = vector.broadcast %18 : vector<1x128xf32> to vector<19x128xf32>
    %20 = arith.addf %17, %19 : vector<19x128xf32>
    %cst = arith.constant 0.000000e+00 : f32
    %21 = vector.broadcast %cst : f32 to vector<19x128xf32>
    %22 = arith.maximumf %20, %21 : vector<19x128xf32>
    %23 = arith.truncf %22 : vector<19x128xf32> to vector<19x128xbf16>
    %c0_9 = arith.constant 0 : index
    %c0_10 = arith.constant 0 : index
    %24 = vector.load %arg6[%c0_9, %c0_10] : memref<128x128xbf16, #tpu.memory_space<vmem>>, vector<128x128xbf16>
    %cst_11 = arith.constant dense<0.000000e+00> : vector<19x128xf32>
    %25 = tpu.matmul %23, %24, %cst_11 {dimension_numbers = #tpu.dot_dimension_numbers<[1], [0], [0], [1], [0, 0, 1, 1], [], []>} : vector<19x128xbf16>, vector<128x128xbf16>, vector<19x128xf32> -> vector<19x128xf32>
    %c0_12 = arith.constant 0 : index
    %c0_13 = arith.constant 0 : index
    %26 = vector.load %arg7[%c0_12, %c0_13] : memref<1x128xf32, #tpu.memory_space<vmem>>, vector<1x128xf32>
    %27 = vector.broadcast %26 : vector<1x128xf32> to vector<19x128xf32>
    %28 = arith.addf %25, %27 : vector<19x128xf32>
    %cst_14 = arith.constant 0.000000e+00 : f32
    %29 = vector.broadcast %cst_14 : f32 to vector<19x128xf32>
    %30 = arith.maximumf %28, %29 : vector<19x128xf32>
    %c0_15 = arith.constant 0 : index
    %c0_16 = arith.constant 0 : index
    %31 = vector.load %arg19[%c0_15, %c0_16] : memref<24x128xf32, #tpu.memory_space<vmem>>, vector<19x128xf32>
    tpu.vector_store %arg19[%c0_15, %c0_16], %30 {strides = array<i32>} : memref<24x128xf32, #tpu.memory_space<vmem>>, vector<19x128xf32>,
    %32 = vector.extract_strided_slice %30 {offsets = [0, 0], sizes = [17, 128], strides = [1, 1]} : vector<19x128xf32> to vector<17x128xf32>
    %33 = arith.truncf %32 : vector<17x128xf32> to vector<17x128xbf16>
    %c2 = arith.constant 2 : index
    %c0_17 = arith.constant 0 : index
    %34 = vector.load %arg19[%c2, %c0_17] : memref<24x128xf32, #tpu.memory_space<vmem>>, vector<17x128xf32>
    %35 = arith.truncf %34 : vector<17x128xf32> to vector<17x128xbf16>
    %36 = tpu.concatenate %33, %35 in 1 : vector<17x128xbf16>, vector<17x128xbf16> -> vector<17x256xbf16>
    %c0_18 = arith.constant 0 : index
    %c0_19 = arith.constant 0 : index
    %37 = vector.load %arg8[%c0_18, %c0_19] : memref<256x128xbf16, #tpu.memory_space<vmem>>, vector<256x128xbf16>
    %cst_20 = arith.constant dense<0.000000e+00> : vector<17x128xf32>
    %38 = tpu.matmul %36, %37, %cst_20 {dimension_numbers = #tpu.dot_dimension_numbers<[1], [0], [0], [1], [0, 0, 1, 1], [], []>} : vector<17x256xbf16>, vector<256x128xbf16>, vector<17x128xf32> -> vector<17x128xf32>
    %c0_21 = arith.constant 0 : index
    %c0_22 = arith.constant 0 : index
    %39 = vector.load %arg9[%c0_21, %c0_22] : memref<1x128xf32, #tpu.memory_space<vmem>>, vector<1x128xf32>
    %40 = vector.broadcast %39 : vector<1x128xf32> to vector<17x128xf32>
    %41 = arith.addf %38, %40 : vector<17x128xf32>
    %cst_23 = arith.constant 0.000000e+00 : f32
    %42 = vector.broadcast %cst_23 : f32 to vector<17x128xf32>
    %43 = arith.maximumf %41, %42 : vector<17x128xf32>
    %44 = arith.truncf %43 : vector<17x128xf32> to vector<17x128xbf16>
    %c0_24 = arith.constant 0 : index
    %c0_25 = arith.constant 0 : index
    %45 = vector.load %arg10[%c0_24, %c0_25] : memref<128x128xbf16, #tpu.memory_space<vmem>>, vector<128x128xbf16>
    %cst_26 = arith.constant dense<0.000000e+00> : vector<17x128xf32>
    %46 = tpu.matmul %44, %45, %cst_26 {dimension_numbers = #tpu.dot_dimension_numbers<[1], [0], [0], [1], [0, 0, 1, 1], [], []>} : vector<17x128xbf16>, vector<128x128xbf16>, vector<17x128xf32> -> vector<17x128xf32>
    %c0_27 = arith.constant 0 : index
    %c0_28 = arith.constant 0 : index
    %47 = vector.load %arg11[%c0_27, %c0_28] : memref<1x128xf32, #tpu.memory_space<vmem>>, vector<1x128xf32>
    %48 = vector.broadcast %47 : vector<1x128xf32> to vector<17x128xf32>
    %49 = arith.addf %46, %48 : vector<17x128xf32>
    %cst_29 = arith.constant 0.000000e+00 : f32
    %50 = vector.broadcast %cst_29 : f32 to vector<17x128xf32>
    %51 = arith.maximumf %49, %50 : vector<17x128xf32>
    %c0_30 = arith.constant 0 : index
    %c0_31 = arith.constant 0 : index
    %52 = vector.load %arg19[%c0_30, %c0_31] : memref<24x128xf32, #tpu.memory_space<vmem>>, vector<17x128xf32>
    tpu.vector_store %arg19[%c0_30, %c0_31], %51 {strides = array<i32>} : memref<24x128xf32, #tpu.memory_space<vmem>>, vector<17x128xf32>,
    %53 = vector.extract_strided_slice %51 {offsets = [0, 0], sizes = [16, 128], strides = [1, 1]} : vector<17x128xf32> to vector<16x128xf32>
    %54 = arith.truncf %53 : vector<16x128xf32> to vector<16x128xbf16>
    %c1 = arith.constant 1 : index
    %c0_32 = arith.constant 0 : index
    %55 = vector.load %arg19[%c1, %c0_32] : memref<24x128xf32, #tpu.memory_space<vmem>>, vector<16x128xf32>
    %56 = arith.truncf %55 : vector<16x128xf32> to vector<16x128xbf16>
    %57 = tpu.concatenate %54, %56 in 1 : vector<16x128xbf16>, vector<16x128xbf16> -> vector<16x256xbf16>
    %c0_33 = arith.constant 0 : index
    %c0_34 = arith.constant 0 : index
    %58 = vector.load %arg12[%c0_33, %c0_34] : memref<256x128xbf16, #tpu.memory_space<vmem>>, vector<256x128xbf16>
    %cst_35 = arith.constant dense<0.000000e+00> : vector<16x128xf32>
    %59 = tpu.matmul %57, %58, %cst_35 {dimension_numbers = #tpu.dot_dimension_numbers<[1], [0], [0], [1], [0, 0, 1, 1], [], []>} : vector<16x256xbf16>, vector<256x128xbf16>, vector<16x128xf32> -> vector<16x128xf32>
    %c0_36 = arith.constant 0 : index
    %c0_37 = arith.constant 0 : index
    %60 = vector.load %arg13[%c0_36, %c0_37] : memref<1x128xf32, #tpu.memory_space<vmem>>, vector<1x128xf32>
    %61 = vector.broadcast %60 : vector<1x128xf32> to vector<16x128xf32>
    %62 = arith.addf %59, %61 : vector<16x128xf32>
    %cst_38 = arith.constant 0.000000e+00 : f32
    %63 = vector.broadcast %cst_38 : f32 to vector<16x128xf32>
    %64 = arith.maximumf %62, %63 : vector<16x128xf32>
    %65 = arith.truncf %64 : vector<16x128xf32> to vector<16x128xbf16>
    %c0_39 = arith.constant 0 : index
    %c0_40 = arith.constant 0 : index
    %66 = vector.load %arg14[%c0_39, %c0_40] : memref<128x128xbf16, #tpu.memory_space<vmem>>, vector<128x128xbf16>
    %cst_41 = arith.constant dense<0.000000e+00> : vector<16x128xf32>
    %67 = tpu.matmul %65, %66, %cst_41 {dimension_numbers = #tpu.dot_dimension_numbers<[1], [0], [0], [1], [0, 0, 1, 1], [], []>} : vector<16x128xbf16>, vector<128x128xbf16>, vector<16x128xf32> -> vector<16x128xf32>
    %c0_42 = arith.constant 0 : index
    %c0_43 = arith.constant 0 : index
    %68 = vector.load %arg15[%c0_42, %c0_43] : memref<1x128xf32, #tpu.memory_space<vmem>>, vector<1x128xf32>
    %69 = vector.broadcast %68 : vector<1x128xf32> to vector<16x128xf32>
    %70 = arith.addf %67, %69 : vector<16x128xf32>
    %cst_44 = arith.constant 0.000000e+00 : f32
    %71 = vector.broadcast %cst_44 : f32 to vector<16x128xf32>
    %72 = arith.maximumf %70, %71 : vector<16x128xf32>
    %73 = arith.truncf %72 : vector<16x128xf32> to vector<16x128xbf16>
    %c0_45 = arith.constant 0 : index
    %c0_46 = arith.constant 0 : index
    %74 = vector.load %arg16[%c0_45, %c0_46] : memref<128x128xbf16, #tpu.memory_space<vmem>>, vector<128x128xbf16>
    %cst_47 = arith.constant dense<0.000000e+00> : vector<16x128xf32>
    %75 = tpu.matmul %73, %74, %cst_47 {dimension_numbers = #tpu.dot_dimension_numbers<[1], [0], [0], [1], [0, 0, 1, 1], [], []>} : vector<16x128xbf16>, vector<128x128xbf16>, vector<16x128xf32> -> vector<16x128xf32>
    %c0_48 = arith.constant 0 : index
    %c0_49 = arith.constant 0 : index
    %76 = vector.load %arg17[%c0_48, %c0_49] : memref<1x128xf32, #tpu.memory_space<vmem>>, vector<1x128xf32>
    %77 = vector.broadcast %76 : vector<1x128xf32> to vector<16x128xf32>
    %78 = arith.addf %75, %77 : vector<16x128xf32>
    %79 = arith.truncf %78 : vector<16x128xf32> to vector<16x128xbf16>
    %c0_50 = arith.constant 0 : index
    %c0_51 = arith.constant 0 : index
    %c0_52 = arith.constant 0 : index
    %80 = vector.load %arg18[%c0_50, %c0_51, %c0_52] : memref<1x16x128xbf16, #tpu.memory_space<vmem>>, vector<1x16x128xbf16>
    %81 = vector.shape_cast %80 : vector<1x16x128xbf16> to vector<16x128xbf16>
    %82 = vector.shape_cast %79 : vector<16x128xbf16> to vector<1x16x128xbf16>
    tpu.vector_store %arg18[%c0_50, %c0_51, %c0_52], %82 {strides = array<i32>} : memref<1x16x128xbf16, #tpu.memory_space<vmem>>, vector<1x16x128xbf16>,
    return
  }
  func.func @transform_0(%arg0: i32, %arg1: i32) -> (i32, i32, i32) {
    %c0_i32 = arith.constant 0 : i32
    %c0_i32_0 = arith.constant 0 : i32
    %c0_i32_1 = arith.constant 0 : i32
    return %arg0, %c0_i32, %c0_i32_0 : i32, i32, i32
  }
  func.func @transform_1(%arg0: i32, %arg1: i32) -> (i32, i32) {
    %c0_i32 = arith.constant 0 : i32
    %c0_i32_0 = arith.constant 0 : i32
    %c0_i32_1 = arith.constant 0 : i32
    return %c0_i32, %c0_i32_0 : i32, i32
  }
  func.func @transform_2(%arg0: i32, %arg1: i32) -> (i32, i32) {
    %c0_i32 = arith.constant 0 : i32
    %c0_i32_0 = arith.constant 0 : i32
    %c0_i32_1 = arith.constant 0 : i32
    return %c0_i32, %c0_i32_0 : i32, i32
  }
  func.func @transform_3(%arg0: i32, %arg1: i32) -> (i32, i32) {
    %c0_i32 = arith.constant 0 : i32
    %c0_i32_0 = arith.constant 0 : i32
    %c0_i32_1 = arith.constant 0 : i32
    return %c0_i32, %c0_i32_0 : i32, i32
  }
  func.func @transform_4(%arg0: i32, %arg1: i32) -> (i32, i32) {
    %c0_i32 = arith.constant 0 : i32
    %c0_i32_0 = arith.constant 0 : i32
    %c0_i32_1 = arith.constant 0 : i32
    return %c0_i32, %c0_i32_0 : i32, i32
  }
  func.func @transform_5(%arg0: i32, %arg1: i32) -> (i32, i32) {
    %c0_i32 = arith.constant 0 : i32
    %c0_i32_0 = arith.constant 0 : i32
    %c0_i32_1 = arith.constant 0 : i32
    return %c0_i32, %c0_i32_0 : i32, i32
  }
  func.func @transform_6(%arg0: i32, %arg1: i32) -> (i32, i32) {
    %c0_i32 = arith.constant 0 : i32
    %c0_i32_0 = arith.constant 0 : i32
    %c0_i32_1 = arith.constant 0 : i32
    return %c0_i32, %c0_i32_0 : i32, i32
  }
  func.func @transform_7(%arg0: i32, %arg1: i32) -> (i32, i32) {
    %c0_i32 = arith.constant 0 : i32
    %c0_i32_0 = arith.constant 0 : i32
    %c0_i32_1 = arith.constant 0 : i32
    return %c0_i32, %c0_i32_0 : i32, i32
  }
  func.func @transform_8(%arg0: i32, %arg1: i32) -> (i32, i32) {
    %c0_i32 = arith.constant 0 : i32
    %c0_i32_0 = arith.constant 0 : i32
    %c0_i32_1 = arith.constant 0 : i32
    return %c0_i32, %c0_i32_0 : i32, i32
  }
  func.func @transform_9(%arg0: i32, %arg1: i32) -> (i32, i32) {
    %c0_i32 = arith.constant 0 : i32
    %c0_i32_0 = arith.constant 0 : i32
    %c0_i32_1 = arith.constant 0 : i32
    return %c0_i32, %c0_i32_0 : i32, i32
  }
  func.func @transform_10(%arg0: i32, %arg1: i32) -> (i32, i32) {
    %c0_i32 = arith.constant 0 : i32
    %c0_i32_0 = arith.constant 0 : i32
    %c0_i32_1 = arith.constant 0 : i32
    return %c0_i32, %c0_i32_0 : i32, i32
  }
  func.func @transform_11(%arg0: i32, %arg1: i32) -> (i32, i32) {
    %c0_i32 = arith.constant 0 : i32
    %c0_i32_0 = arith.constant 0 : i32
    %c0_i32_1 = arith.constant 0 : i32
    return %c0_i32, %c0_i32_0 : i32, i32
  }
  func.func @transform_12(%arg0: i32, %arg1: i32) -> (i32, i32) {
    %c0_i32 = arith.constant 0 : i32
    %c0_i32_0 = arith.constant 0 : i32
    %c0_i32_1 = arith.constant 0 : i32
    return %c0_i32, %c0_i32_0 : i32, i32
  }
  func.func @transform_13(%arg0: i32, %arg1: i32) -> (i32, i32) {
    %c0_i32 = arith.constant 0 : i32
    %c0_i32_0 = arith.constant 0 : i32
    %c0_i32_1 = arith.constant 0 : i32
    return %c0_i32, %c0_i32_0 : i32, i32
  }
  func.func @transform_14(%arg0: i32, %arg1: i32) -> (i32, i32) {
    %c0_i32 = arith.constant 0 : i32
    %c0_i32_0 = arith.constant 0 : i32
    %c0_i32_1 = arith.constant 0 : i32
    return %c0_i32, %c0_i32_0 : i32, i32
  }
  func.func @transform_15(%arg0: i32, %arg1: i32) -> (i32, i32) {
    %c0_i32 = arith.constant 0 : i32
    %c0_i32_0 = arith.constant 0 : i32
    %c0_i32_1 = arith.constant 0 : i32
    return %c0_i32, %c0_i32_0 : i32, i32
  }
  func.func @transform_16(%arg0: i32, %arg1: i32) -> (i32, i32, i32) {
    %c0_i32 = arith.constant 0 : i32
    %c0_i32_0 = arith.constant 0 : i32
    return %arg0, %arg1, %c0_i32 : i32, i32, i32
  }
}

</mosaic_0001>

<bundles_post_ra>
// kernel: tpu_custom_call.1
= control target key start
LH: loop header
LB: loop body
LE: loop exit
PB: predicated region body
PF: predicated region fallthrough
CT: control target
= control target key end

     0   :  { %s2666_s0 = inlined_call_operand.vmem [shape: f32[2,24,1], index: 0, kind: input, shape index: {}]   ;;  %s2667_s1 = inlined_call_operand.vmem [shape: f32[1,128], index: 1, kind: input, shape index: {}]   ;;  %s2668_s2 = inlined_call_operand.vmem [shape: f32[1,128], index: 2, kind: input, shape index: {}]   ;;  %s2669_s3 = inlined_call_operand.vmem [shape: f32[1,128], index: 3, kind: input, shape index: {}]   ;;  %s2670_s4 = inlined_call_operand.hbm [shape: bf16[128,128], index: 4, kind: input, shape index: {}]   ;;  %s2671_s5 = inlined_call_operand.vmem [shape: f32[1,128], index: 5, kind: input, shape index: {}]   ;;  %s2672_s6 = inlined_call_operand.hbm [shape: bf16[256,128], index: 6, kind: input, shape index: {}]   ;;  %s2673_s7 = inlined_call_operand.vmem [shape: f32[1,128], index: 7, kind: input, shape index: {}]   ;;  %s2674_s8 = inlined_call_operand.hbm [shape: bf16[128,128], index: 8, kind: input, shape index: {}]   ;;  %s2675_s9 = inlined_call_operand.vmem [shape: f32[1,128], index: 9, kind: input, shape index: {}]   ;;  %s2676_s10 = inlined_call_operand.hbm [shape: bf16[256,128], index: 10, kind: input, shape index: {}]   ;;  %s2677_s11 = inlined_call_operand.vmem [shape: f32[1,128], index: 11, kind: input, shape index: {}]   ;;  %s2678_s12 = inlined_call_operand.hbm [shape: bf16[128,128], index: 12, kind: input, shape index: {}]   ;;  %s2679_s13 = inlined_call_operand.vmem [shape: f32[1,128], index: 13, kind: input, shape index: {}]   ;;  %s2680_s14 = inlined_call_operand.hbm [shape: bf16[128,128], index: 14, kind: input, shape index: {}]   ;;  %s2681_s15 = inlined_call_operand.vmem [shape: f32[1,128], index: 15, kind: input, shape index: {}]   ;;  %s2682_s16 = inlined_call_operand.hbm [shape: bf16[2,16,128], index: 16, kind: output, shape index: {}]  }
   0x1   :  { %2693 = sst [smem:[#allocation28_spill]] %s2666_s0 }
   0x2   :  { %2694 = sst [smem:[#allocation29_spill]] %s2672_s6 }
   0x3   :  { %2695 = sst [smem:[#allocation30_spill]] %s2676_s10 }
   0x4   :  { %2696 = sst [smem:[#allocation31_spill]] %s2681_s15 }
   0x5   :  { %2697 = sst [smem:[#allocation32_spill]] %s2682_s16 }
   0x6   :  { %21 = vsyncpa [#allocation4], 0 }
   0x7   :  { %22 = vsyncpa [#allocation7], 0 }
   0x8   :  { %23 = vsyncpa [#allocation10], 0 }
   0x9   :  { %24 = vsyncpa [#allocation13], 0 }
   0xa   :  { %25 = vsyncpa [#allocation5], 0 }
   0xb   :  { %27 = vsyncpa [#allocation5 + $0x1], 0  ;;  %s2457_s21 = smov 0   ;;  %s2459_s22 = smov 0  }
   0xc   :  { %s2461_s23 = smov 0   ;;  %s2463_s24 = smov 0  }
   0xd   :  { %s2465_s25 = smov 0   ;;  %s2467_s26 = smov 0  }
   0xe LB: > { %2698 = sst [smem:[#allocation20_spill]] %s2339_s21  ;;  %s1598_s27 = sadd.s32 4294967295, %s2359_s26   ;;  %s2359_s26 = sphi %s2467_s26, %s33_s26   ;;  %s2355_s25 = sphi %s2465_s25, %s2723_s25   ;;  %s2351_s24 = sphi %s2463_s24, %s2722_s24   ;;  %s2347_s23 = sphi %s2461_s23, %s2721_s23   ;;  %s2343_s22 = sphi %s2459_s22, %s2725_s22   ;;  %s2339_s21 = sphi %s2457_s21, %s2724_s21  }
   0xf   : > { %2699 = sst [smem:[#allocation21_spill]] %s2347_s23  ;;  %s1599_s28 = sadd.s32 4294967294, %s2359_s26  }
  0x10   : > { %2700 = sst [smem:[#allocation22_spill]] %s2355_s25  ;;  %s45_s29 = sadd.s32 1, %s2355_s25 }
  0x11   : > { %2701 = sst [smem:[#allocation23_spill]] %s2359_s26  ;;  %s395_s30 = sadd.s32 1, %s2347_s23 }
  0x12   : > { %p47_p0 = scmp.ge.s32.totalorder %s45_s29, 2  ;;  %p405_p1 = scmp.ne.s32.totalorder %s2347_s23, %s2343_s22 }
  0x13   : > { %p406_p2 = scmp.eq.s32.totalorder %s1598_s27, 1  ;;  %p411_p3 = scmp.ne.s32.totalorder %s2343_s22, %s2339_s21 }
  0x14   : > { %s2727_s29 = smov (%p47_p0, %s45_s29), 0  ;;  %p412_p5 = scmp.eq.s32.totalorder %s1599_s28, 1 }
  0x15   : > { %2702 = sst [smem:[#allocation24_spill]] %s2727_s29  ;;  %p2497_p4 = por %p406_p2, %p405_p1 }
  0x16   : > { %s390_s17 = ssub.s32 %s2355_s25, %s2727_s29  ;;  %p1600_p6 = scmp.ge.s32.totalorder %s2359_s26, 1 }
  0x17   : > { %s2703_s0 = scalar_select %p2497_p4, 1, 0 }
  0x18   : > { %p393_p7 = scmp.eq.s32.totalorder %s390_s17, 0  ;;  %p2504_p8 = por %p412_p5, %p411_p3 }
  0x19   : > { %2704 = sst [smem:[#allocation25_spill]] %s2703_s0  ;;  %p419_p9 = scmp.lt.s32.totalorder %s2359_s26, 3 }
  0x1a   : > { %s2705_s18 = scalar_select %p2504_p8, 1, 0 }
  0x1b   : > { %s2510_s19 = scalar_select %p393_p7, %s2347_s23, %s395_s30  }
  0x1c   : > { %2706 = sst [smem:[#allocation26_spill]] %s2705_s18  ;;  %p2512_p10 = pnand %p1600_p6, %p419_p9 }
  0x1d   : > { %2707 = sst [smem:[#allocation27_spill]] %s2510_s19  ;;  %p2516_p11 = scmp.eq.s32.totalorder %s1598_s27, 0 }
  0x1e   : > { %p1978_p12 = pneg %p2512_p10  ;;  %s2710_s6 = sld [smem:[#allocation29_spill]] }
  0x1f   : > { %s2361_s25 = smov [#allocation6]   ;;  %s2712_s10 = sld [smem:[#allocation30_spill]] }
  0x20   : > { %p2527_p13 = pnand %p2516_p11, %p1978_p12  ;;  %s458_s27 = sshll.u32 %s2361_s25, 4  ;;  %s459_s27 = int_to_ptr.vmem [resolvable:$true] %s458_s27 }
  0x21   : > { %s2362_s26 = smov 64   ;;  %s2363_s28 = smov 4  }
  0x22   : > { %s2364_s17 = smov [#allocation9]   ;;  %s439_s15 = sshll.u32 %s2670_s4, 4  ;;  %s440_s15 = int_to_ptr.hbm [resolvable:$true] %s439_s15 }
  0x23   : > { %s2365_s23 = smov [#allocation3]  }
  0x24   : > { %s456_s29 = sshll.u32 %s2710_s6, 4  ;;  %s492_s6 = sshll.u32 %s2364_s17, 4  ;;  %s457_s29 = int_to_ptr.hbm [resolvable:$true] %s456_s29  ;;  %s493_s6 = int_to_ptr.vmem [resolvable:$true] %s492_s6 }
  0x25   : > { %s490_s18 = sshll.u32 %s2712_s10, 4  ;;  %s441_s19 = sshll.u32 %s2365_s23, 4  ;;  %s491_s18 = int_to_ptr.hbm [resolvable:$true] %s490_s18  ;;  %s442_s19 = int_to_ptr.vmem [resolvable:$true] %s441_s19 }
  0x26   : > { %1984 = dma.hbm_to_vmem [thread:$0]  (!%p2527_p13), %s457_s29, 2048, %s459_s27, [#allocation7], %s2362_s26, %s2362_s26, %s2363_s28  }
  0x27   : > { %1990 = dma.hbm_to_vmem [thread:$0]  (!%p2527_p13), %s491_s18, 2048, %s493_s6, [#allocation10], %s2362_s26, %s2362_s26, %s2363_s28  }
  0x28   : > { %s473_s29 = sshll.u32 %s2674_s8, 4  ;;  %s507_s6 = sshll.u32 %s2678_s12, 4  ;;  %s474_s29 = int_to_ptr.hbm [resolvable:$true] %s473_s29  ;;  %s508_s6 = int_to_ptr.hbm [resolvable:$true] %s507_s6 }
  0x29   : > { %1981 = dma.hbm_to_vmem [thread:$0]  (!%p2527_p13), %s440_s15, 1024, %s442_s19, [#allocation4], %s2362_s26, %s2362_s26, %s2363_s28  }
  0x2a   : > { %s2366_s18 = smov [#allocation8]   ;;  %s2367_s10 = smov [#allocation11]  }
  0x2b   : > { %s475_s17 = sshll.u32 %s2366_s18, 4  ;;  %s509_s16 = sshll.u32 %s2367_s10, 4  ;;  %s476_s17 = int_to_ptr.vmem [resolvable:$true] %s475_s17  ;;  %s510_s16 = int_to_ptr.vmem [resolvable:$true] %s509_s16 }
  0x2c   : > { %1987 = dma.hbm_to_vmem [thread:$0]  (!%p2527_p13), %s474_s29, 1024, %s476_s17, [#allocation7], %s2362_s26, %s2362_s26, %s2363_s28  }
  0x2d   : > { %s524_s15 = sshll.u32 %s2680_s14, 4  ;;  %s2368_s19 = smov [#allocation12]   ;;  %s525_s15 = int_to_ptr.hbm [resolvable:$true] %s524_s15 }
  0x2e   : > { %1993 = dma.hbm_to_vmem [thread:$0]  (!%p2527_p13), %s508_s6, 1024, %s510_s16, [#allocation10], %s2362_s26, %s2362_s26, %s2363_s28  }
  0x2f   : > { %s526_s0 = sshll.u32 %s2368_s19, 4  ;;  %553 = sbr.rel (%p2512_p10) target bundleno = 1107 (0x453), region = 84  ;;  %s527_s0 = int_to_ptr.vmem [resolvable:$true] %s526_s0 }
  0x30   : > { %1996 = dma.hbm_to_vmem [thread:$0]  (!%p2527_p13), %s525_s15, 1024, %s527_s0, [#allocation13], %s2362_s26, %s2362_s26, %s2363_s28  }
  0x34   : > { %2318 = dma.done.wait (%p2516_p11), [#allocation4], 1024  }
  0x35   : > { %2320 = vsyncadd (%p2516_p11), [#allocation4], 4294966272 }
  0x36   : > { %2322 = dma.done.wait (%p2516_p11), [#allocation7], 3072  }
  0x37   : > { %2324 = vsyncadd (%p2516_p11), [#allocation7], 4294964224 }
  0x38   : > { %2326 = dma.done.wait (%p2516_p11), [#allocation10], 3072  }
  0x39   : > { %2328 = vsyncadd (%p2516_p11), [#allocation10], 4294964224 }
  0x3a   : > { %2330 = dma.done.wait (%p2516_p11), [#allocation13], 1024  }
  0x3b   : > { %2332 = vsyncadd (%p2516_p11), [#allocation13], 4294966272  ;;  %p629_p0 = scmp.lt.s32.totalorder %s2351_s24, 1  ;;  %v2369_v0 = vmov 0   ;;  %s2713_s29 = sld [smem:[#allocation28_spill]]  ;;  %v1888_v4 = vld [vmem:[#allocation3 + $0x38] sm:$0xff] }
  0x3c   : > { %2074 = vset.pattern.permute.xlu1 %v2369_v0  ;;  %2073 = vset.pattern.permute.xlu0 %v2369_v0  ;;  %v1887_v5 = vld [vmem:[#allocation3 + $0x30] sm:$0xff]  ;;  %v1886_v9 = vld [vmem:[#allocation3 + $0x28] sm:$0xff]  ;;  %v1885_v10 = vld [vmem:[#allocation3 + $0x20] sm:$0xff]  ;;  %s1945_s6 = sshll.u32 %s2351_s24, 3  ;;  %s2714_s10 = sld [smem:[#allocation32_spill]] }
  0x3d   : > { %s630_s26 = scalar_select %p629_p0, %s2351_s24, 1  ;;  %2075 = vset.pattern.permute.xlu2 %v2369_v0  ;;  %772 = vmatpush.bf16.msra.mxu0 %v1888_v4  ;;  %v1884_v11 = vld [vmem:[#allocation3 + $0x18] sm:$0xff]  ;;  %v1883_v12 = vld [vmem:[#allocation3 + $0x10] sm:$0xff]  ;;  %v1882_v13 = vld [vmem:[#allocation3 + $0x8] sm:$0xff] }
  0x3e   : > { %v1881_v14 = vld [vmem:[#allocation3] sm:$0xff]  ;;  %v2076_v15 = vld [vmem:[%s2668_s2] ss:$0 sm:$0xff]  ;;  %v1896_v21 = vld [vmem:[#allocation6 + $0x38] sm:$0xff]  ;;  %s2715_s15 = sld [smem:[#allocation31_spill]] }
  0x3f   : > { %s1951_s20 = smul.u32 24, %s630_s26  ;;  %v2077_v16 = vld [vmem:[%s2667_s1] ss:$0 sm:$0xff]  ;;  %957 = vmatpush.bf16.msra.mxu1 %v1896_v21  ;;  %v1895_v23 = vld [vmem:[#allocation6 + $0x30] sm:$0xff]  ;;  %v1893_v44 = vld [vmem:[#allocation6 + $0x20] sm:$0xff] }
  0x40   : > { %v2078_v25 = vld [vmem:[%s2669_s3] ss:$0 sm:$0xff]  ;;  %v1892_v45 = vld [vmem:[#allocation6 + $0x18] sm:$0xff]  ;;  %v1891_v47 = vld [vmem:[#allocation6 + $0x10] sm:$0xff] }
  0x41   : > { %s633_s27 = scalar_lea.vmem %s2713_s29, %s1951_s20  ;;  %773 = vmatpush.bf16.msra.mxu0 %v1887_v5  ;;  %v1894_v30 = vld [vmem:[#allocation6 + $0x28] sm:$0xff]  ;;  %v1904_v46 = vld [vmem:[#allocation6 + $0x78] sm:$0xff]  ;;  %v1903_v48 = vld [vmem:[#allocation6 + $0x70] sm:$0xff] }
  0x42   : > { %v1617_v1 = vld [vmem:[%s633_s27 + $0x4] sm:$0xff]  ;;  %v639_v3 = vld [vmem:[%s633_s27 + $0x10] sm:$0x7]  ;;  %v1619_v8 = vld [vmem:[%s633_s27 + $0x14] sm:$0x7]  ;;  %975 = vmatpush.bf16.msra.mxu2 %v1904_v46  ;;  %s1456_s16 = scalar_lea.hbm %s2714_s10, %s1945_s6  ;;  %s2285_s6 = scalar_lea.hbm %s2714_s10, 16 }
  0x43   : > { %v637_v2 = vld [vmem:[%s633_s27] sm:$0xff]  ;;  %670 = vperm.xlu1 %2074, %v1617_v1   ;;  %658 = vperm.xlu2 %2075, %v639_v3   ;;  %v1618_v6 = vld [vmem:[%s633_s27 + $0xc] sm:$0xff]  ;;  %v1889_v51 = vld [vmem:[#allocation6] sm:$0xff]  ;;  %s1459_s20 = sshll.u32 %s1456_s16, 4  ;;  %s1460_s20 = int_to_ptr.hbm [resolvable:$true] %s1459_s20 }
  0x44   : > { %648 = vperm.xlu0 %2073, %v637_v2   ;;  %v638_v7 = vld [vmem:[%s633_s27 + $0x8] sm:$0xff]  ;;  %958 = vmatpush.bf16.msra.mxu1 %v1895_v23  ;;  %v1890_v49 = vld [vmem:[#allocation6 + $0x8] sm:$0xff]  ;;  %v1901_v52 = vld [vmem:[#allocation6 + $0x60] sm:$0xff]  ;;  %s626_s27 = sand.u32 1, %s2343_s22   ;;  %s2279_s30 = sshra.s32 %s1460_s20, 4  ;;  %s2280_s30 = int_to_ptr.hbm [resolvable:$true] %s2279_s30 }
  0x45   : > { %774 = vmatpush.bf16.msra.mxu0 %v1886_v9  ;;  %v1902_v50 = vld [vmem:[#allocation6 + $0x68] sm:$0xff]  ;;  %v1900_v53 = vld [vmem:[#allocation6 + $0x58] sm:$0xff]  ;;  %v1899_v54 = vld [vmem:[#allocation6 + $0x50] sm:$0xff]  ;;  %s1615_s21 = sshll.u32 %s626_s27, 3  ;;  %s1443_s24 = scalar_lea.sflag [#allocation5], %s626_s27 }
  0x46   : > { %976 = vmatpush.bf16.msra.mxu2 %v1903_v48  ;;  %v1898_v55 = vld [vmem:[#allocation6 + $0x48] sm:$0xff]  ;;  %v1897_v56 = vld [vmem:[#allocation6 + $0x40] sm:$0xff]  ;;  %v1912_v23 = vld [vmem:[#allocation8 + $0x38] sm:$0xff]  ;;  %s628_s0 = scalar_lea.vmem [#allocation14], %s1615_s21  ;;  %s2281_s28 = scalar_lea.hbm %s2280_s30, 8 }
  0x47   : > { %v2079_v57 = vld [vmem:[%s2671_s5] ss:$0 sm:$0xff]  ;;  %1066 = vmatpush.bf16.msra.mxu3 %v1912_v23  ;;  %s2631_s26 = sshll.u32 %s628_s0, 4  ;;  %p2282_p1 = scmp.ne.s32.totalorder %s2280_s30, %s2281_s28  ;;  %s1458_s26 = int_to_ptr.vmem [resolvable:$true] %s2631_s26 }
  0x48   : > { %959 = vmatpush.bf16.msra.mxu1 %v1894_v30  ;;  %p2286_p5 = scmp.lt.s32.totalorder %s2280_s30, %s2714_s10  ;;  %p2287_p6 = scmp.lt.s32.totalorder %s2285_s6, %s2281_s28 }
  0x49   : > { %775 = vmatpush.bf16.msra.mxu0 %v1885_v10  ;;  %p2283_p2 = pnand %p2282_p1, %p2497_p4 }
  0x4a   : > { %977 = vmatpush.bf16.msra.mxu2 %v1902_v50  ;;  %p2288_p7 = por %p2287_p6, %p2286_p5 }
  0x4b   : > { %675 = vperm.xlu1 %2074, %v1618_v6   ;;  %680 = vperm.xlu2 %2075, %v1619_v8   ;;  %p2284_p3 = pneg %p2283_p2 }
  0x4c   : > { %653 = vperm.xlu0 %2073, %v638_v7   ;;  %960 = vmatpush.bf16.msra.mxu1 %v1893_v44 }
  0x4d   : > { %776 = vmatpush.bf16.msra.mxu0 %v1884_v11  ;;  %p2289_p9 = pnand %p2288_p7, %p2284_p3 }
  0x4e   : > { %978 = vmatpush.bf16.msra.mxu2 %v1901_v52 }
  0x50   : > { %961 = vmatpush.bf16.msra.mxu1 %v1892_v45 }
  0x51   : > { %777 = vmatpush.bf16.msra.mxu0 %v1883_v12 }
  0x52   : > { %979 = vmatpush.bf16.msra.mxu2 %v1900_v53 }
  0x54   : > { %962 = vmatpush.bf16.msra.mxu1 %v1891_v47 }
  0x55   : > { %778 = vmatpush.bf16.msra.mxu0 %v1882_v13 }
  0x56   : > { %980 = vmatpush.bf16.msra.mxu2 %v1899_v54  ;;  %v1917_v54 = vld [vmem:[#allocation9 + $0x20] sm:$0xff] }
  0x58   : > { %963 = vmatpush.bf16.msra.mxu1 %v1890_v49 }
  0x59   : > { %779 = vmatpush.bf16.msra.mxu0 %v1881_v14 }
  0x5a   : > { %981 = vmatpush.bf16.msra.mxu2 %v1898_v55  ;;  %v1928_v55 = vld [vmem:[#allocation9 + $0x78] sm:$0xff] }
  0x5c   : > { %964 = vmatpush.bf16.msra.mxu1 %v1889_v51 }
  0x5e   : > { %982 = vmatpush.bf16.msra.mxu2 %v1897_v56  ;;  %v1916_v56 = vld [vmem:[#allocation9 + $0x18] sm:$0xff] }
  0x60   : > { %1254 = vmatpush.bf16.msrb.mxu1 %v1928_v55  ;;  %v2083_v55 = vld [vmem:[%s2679_s13] ss:$0 sm:$0xff] }
  0x9d   : > { %v659_v22 = vpop.permute.xlu2 %658 }
  0x9e   : > { %v666_v37 = vmul.f32 %v2077_v16, %v659_v22 }
  0xa5   : > { %v681_v34 = vpop.permute.xlu2 %680 }
  0xa6   : > { %v688_v38 = vmul.f32 %v2076_v15, %v681_v34  ;;  %v1920_v34 = vld [vmem:[#allocation9 + $0x38] sm:$0xff] }
  0xa7   : > { %1240 = vmatpush.bf16.msrb.mxu0 %v1920_v34  ;;  %v1944_v34 = vld [vmem:[#allocation12 + $0x38] sm:$0xff] }
  0xa8   : > { %v691_v40 = vadd.f32 %v688_v38, %v666_v37  ;;  %v1919_v37 = vld [vmem:[#allocation9 + $0x30] sm:$0xff] }
  0xaa   : > { %v698_v41 = vadd.f32 %v2078_v25, %v691_v40  ;;  %v1918_v40 = vld [vmem:[#allocation9 + $0x28] sm:$0xff] }
  0xab   : > { %1241 = vmatpush.bf16.msrb.mxu0 %v1919_v37  ;;  %v1941_v37 = vld [vmem:[#allocation12 + $0x20] sm:$0xff] }
  0xac   : > { %v701_v42 = vmax.f32 %v698_v41, 0.0 }
  0xae   : > { %v703_v43 = vpack.c.bf16 %v701_v42, %v701_v42 }
  0xaf   : > { %1242 = vmatpush.bf16.msrb.mxu0 %v1918_v40 }
  0xb3   : > { %1243 = vmatpush.bf16.msrb.mxu0 %v1917_v54 }
  0xb5   : > { %v671_v17 = vpop.permute.xlu1 %670 }
  0xb6   : > { %v649_v18 = vpop.permute.xlu0 %648  ;;  %v686_v19 = vmul.f32 %v2076_v15, %v671_v17 }
  0xb7   : > { %v664_v20 = vmul.f32 %v2077_v16, %v649_v18  ;;  %1244 = vmatpush.bf16.msrb.mxu0 %v1916_v56 }
  0xb9   : > { %v689_v24 = vadd.f32 %v686_v19, %v664_v20 }
  0xbb   : > { %v696_v32 = vadd.f32 %v2078_v25, %v689_v24  ;;  %v1911_v24 = vld [vmem:[#allocation8 + $0x30] sm:$0xff] }
  0xbc   : > { %1067 = vmatpush.bf16.msra.mxu3 %v1911_v24 }
  0xbd   : > { %v676_v26 = vpop.permute.xlu1 %675  ;;  %v699_v35 = vmax.f32 %v696_v32, 0.0 }
  0xbe   : > { %v654_v27 = vpop.permute.xlu0 %653  ;;  %v687_v28 = vmul.f32 %v2076_v15, %v676_v26  ;;  %v1909_v26 = vld [vmem:[#allocation8 + $0x20] sm:$0xff] }
  0xbf   : > { %v665_v29 = vmul.f32 %v2077_v16, %v654_v27  ;;  %v1908_v27 = vld [vmem:[#allocation8 + $0x18] sm:$0xff] }
  0xc1   : > { %v690_v31 = vadd.f32 %v687_v28, %v665_v29  ;;  %v1907_v28 = vld [vmem:[#allocation8 + $0x10] sm:$0xff]  ;;  %v1906_v29 = vld [vmem:[#allocation8 + $0x8] sm:$0xff] }
  0xc3   : > { %v697_v33 = vadd.f32 %v2078_v25, %v690_v31  ;;  %v1910_v25 = vld [vmem:[#allocation8 + $0x28] sm:$0xff]  ;;  %v1905_v31 = vld [vmem:[#allocation8] sm:$0xff] }
  0xc4   : > { %1068 = vmatpush.bf16.msra.mxu3 %v1910_v25 }
  0xc5   : > { %v700_v36 = vmax.f32 %v697_v33, 0.0 }
  0xc7   : > { %v702_v39 = vpack.c.bf16 %v700_v36, %v699_v35  ;;  %v2080_v36 = vld [vmem:[%s2673_s7] ss:$0 sm:$0xff] }
  0xc8   : > { %1069 = vmatpush.bf16.msra.mxu3 %v1909_v26 }
  0xc9   : > { %780 = vmatmul.bf16.vlgmr.msra.gmra.mxu0 %v702_v39 }
  0xcc   : > { %1070 = vmatpush.bf16.msra.mxu3 %v1908_v27  ;;  %v1935_v27 = vld [vmem:[#allocation11 + $0x30] sm:$0xff] }
  0xd0   : > { %1071 = vmatpush.bf16.msra.mxu3 %v1907_v28  ;;  %v1934_v28 = vld [vmem:[#allocation11 + $0x28] sm:$0xff] }
  0xd4   : > { %1072 = vmatpush.bf16.msra.mxu3 %v1906_v29  ;;  %v1933_v29 = vld [vmem:[#allocation11 + $0x20] sm:$0xff] }
  0xd8   : > { %1073 = vmatpush.bf16.msra.mxu3 %v1905_v31  ;;  %v1931_v31 = vld [vmem:[#allocation11 + $0x10] sm:$0xff] }
  0xd9   : > { %785 = vmatmul.bf16.gmra.mxu0 %v703_v43 }
  0xdc   : > { %1424 = vmatpush.bf16.msrb.mxu3 %v1944_v34 }
 0x146   : > { %v781_v58 = vpop.f32.mrf.mxu0 }
 0x147   : > { %v782_v59 = vadd.f32 %v2079_v57, %v781_v58  ;;  %v1915_v58 = vld [vmem:[#allocation9 + $0x10] sm:$0xff] }
 0x148   : > { %1245 = vmatpush.bf16.msrb.mxu0 %v1915_v58 }
 0x149   : > { %v790_v60 = vmax.f32 %v782_v59, 0.0  ;;  %v1926_v59 = vld [vmem:[#allocation9 + $0x68] sm:$0xff] }
 0x14b   : > { %793 = vst [vmem:[#allocation2] sm:$0xff] %v790_v60  ;;  %v796_v63 = vpack.c.bf16 %v790_v60, %v790_v60  ;;  %v1914_v60 = vld [vmem:[#allocation9 + $0x8] sm:$0xff] }
 0x14c   : > { %1246 = vmatpush.bf16.msrb.mxu0 %v1914_v60 }
 0x14d   : > { %v808_v2 = vunpack.c.l.b16 %v796_v63  ;;  %v1924_v63 = vld [vmem:[#allocation9 + $0x58] sm:$0xff] }
 0x14e   : > { %v783_v61 = vpop.f32.mrf.mxu0 }
 0x14f   : > { %v784_v62 = vadd.f32 %v2079_v57, %v783_v61  ;;  %v1925_v61 = vld [vmem:[#allocation9 + $0x60] sm:$0xff] }
 0x151   : > { %v791_v0 = vmax.f32 %v784_v62, 0.0  ;;  %v1913_v62 = vld [vmem:[#allocation9] sm:$0xff] }
 0x152   : > { %1247 = vmatpush.bf16.msrb.mxu0 %v1913_v62 }
 0x153   : > { %794 = vst [vmem:[#allocation2 + $0x8] sm:$0xff] %v791_v0  ;;  %v797_v1 = vpack.c.bf16 %v791_v0, %v791_v0  ;;  %v1923_v0 = vld [vmem:[#allocation9 + $0x50] sm:$0xff] }
 0x155   : > { %v809_v3 = vunpack.c.l.b16 %v797_v1  ;;  %v1922_v1 = vld [vmem:[#allocation9 + $0x48] sm:$0xff] }
 0x156   : > { %v786_v4 = vpop.f32.mrf.mxu0 }
 0x157   : > { %v787_v5 = vadd.f32 %v2079_v57, %v786_v4  ;;  %v811_v6 = vpack.c.b16 %v809_v3, %v808_v2  ;;  %v1927_v57 = vld [vmem:[#allocation9 + $0x70] sm:$0xff]  ;;  %v1921_v2 = vld [vmem:[#allocation9 + $0x40] sm:$0xff]  ;;  %v2081_v3 = vld [vmem:[%s2675_s9] ss:$0 sm:$0xff] }
 0x158   : > { %1255 = vmatpush.bf16.msrb.mxu1 %v1927_v57 }
 0x159   : > { %v792_v7 = vmax.f32 %v787_v5, 0.0  ;;  %965 = vmatmul.bf16.vlgmr.msra.gmra.mxu1 %v811_v6 }
 0x15a   : > { %v799_v9 = vld [vmem:[#allocation2 + $0x2] sm:$0xff] }
 0x15b   : > { %795 = vst [vmem:[#allocation2 + $0x10] sm:$0x7] %v792_v7  ;;  %v798_v10 = vpack.c.bf16 %v792_v7, %v792_v7  ;;  %v802_v11 = vpack.c.bf16 %v799_v9, %v799_v9  ;;  %v1936_v7 = vld [vmem:[#allocation11 + $0x38] sm:$0xff] }
 0x15c   : > { %1256 = vmatpush.bf16.msrb.mxu1 %v1926_v59  ;;  %1339 = vmatpush.bf16.msrb.mxu2 %v1936_v7 }
 0x15d   : > { %v810_v13 = vunpack.c.l.b16 %v798_v10  ;;  %v818_v15 = vunpack.c.l.b16 %v802_v11 }
 0x15e   : > { %v788_v8 = vpop.f32.mrf.mxu0 }
 0x15f   : > { %v812_v17 = vpack.c.b16 %v810_v13, %v810_v13 }
 0x160   : > { %1257 = vmatpush.bf16.msrb.mxu1 %v1925_v61  ;;  %1340 = vmatpush.bf16.msrb.mxu2 %v1935_v27 }
 0x162   : > { %v800_v12 = vld [vmem:[#allocation2 + $0xa] sm:$0xff]  ;;  %v801_v19 = vld [vmem:[#allocation2 + $0x12] sm:$0x1] }
 0x163   : > { %v803_v14 = vpack.c.bf16 %v800_v12, %v800_v12  ;;  %v804_v20 = vpack.c.bf16 %v801_v19, %v801_v19 }
 0x164   : > { %1258 = vmatpush.bf16.msrb.mxu1 %v1924_v63  ;;  %1341 = vmatpush.bf16.msrb.mxu2 %v1934_v28  ;;  %v2084_v63 = vld [vmem:[%s2715_s15] ss:$0 sm:$0xff] }
 0x165   : > { %v819_v16 = vunpack.c.l.b16 %v803_v14  ;;  %v820_v21 = vunpack.c.l.b16 %v804_v20 }
 0x167   : > { %v821_v18 = vpack.c.b16 %v819_v16, %v818_v15  ;;  %v822_v22 = vpack.c.b16 %v820_v21, %v820_v21 }
 0x168   : > { %1259 = vmatpush.bf16.msrb.mxu1 %v1923_v0  ;;  %1342 = vmatpush.bf16.msrb.mxu2 %v1933_v29 }
 0x169   : > { %970 = vmatmul.bf16.gmra.mxu1 %v812_v17  ;;  %983 = vmatmul.bf16.vlgmr.msra.gmra.mxu2 %v821_v18 }
 0x16c   : > { %1260 = vmatpush.bf16.msrb.mxu1 %v1922_v1 }
 0x170   : > { %1261 = vmatpush.bf16.msrb.mxu1 %v1921_v2 }
 0x179   : > { %988 = vmatmul.bf16.gmra.mxu2 %v822_v22 }
 0x1d6   : > { %v966_v30 = vpop.f32.mrf.mxu1 }
 0x1d7   : > { %v967_v39 = vadd.f32 %v2080_v36, %v966_v30  ;;  %v1932_v30 = vld [vmem:[#allocation11 + $0x18] sm:$0xff] }
 0x1d8   : > { %1343 = vmatpush.bf16.msrb.mxu2 %v1932_v30 }
 0x1dc   : > { %1344 = vmatpush.bf16.msrb.mxu2 %v1931_v31 }
 0x1de   : > { %v968_v32 = vpop.f32.mrf.mxu1 }
 0x1df   : > { %v969_v41 = vadd.f32 %v2080_v36, %v968_v32  ;;  %v1930_v32 = vld [vmem:[#allocation11 + $0x8] sm:$0xff] }
 0x1e0   : > { %1345 = vmatpush.bf16.msrb.mxu2 %v1930_v32 }
 0x1e6   : > { %v971_v33 = vpop.f32.mrf.mxu1 }
 0x1e7   : > { %v972_v49 = vadd.f32 %v2080_v36, %v971_v33  ;;  %v1929_v33 = vld [vmem:[#allocation11] sm:$0xff]  ;;  %v1942_v36 = vld [vmem:[#allocation12 + $0x28] sm:$0xff] }
 0x1e8   : > { %1346 = vmatpush.bf16.msrb.mxu2 %v1929_v33 }
 0x1ec   : > { %v984_v35 = vpop.f32.mrf.mxu2 }
 0x1ed   : > { %v985_v42 = vadd.f32 %v984_v35, %v967_v39  ;;  %v1943_v35 = vld [vmem:[#allocation12 + $0x30] sm:$0xff]  ;;  %v1940_v39 = vld [vmem:[#allocation12 + $0x18] sm:$0xff] }
 0x1ee   : > { %v973_v38 = vpop.f32.mrf.mxu1  ;;  %1425 = vmatpush.bf16.msrb.mxu3 %v1943_v35 }
 0x1ef   : > { %v993_v45 = vmax.f32 %v985_v42, 0.0 }
 0x1f2   : > { %1426 = vmatpush.bf16.msrb.mxu3 %v1942_v36 }
 0x1f4   : > { %v986_v43 = vpop.f32.mrf.mxu2 }
 0x1f5   : > { %v987_v44 = vadd.f32 %v986_v43, %v969_v41  ;;  %v2082_v41 = vld [vmem:[%s2677_s11] ss:$0 sm:$0xff] }
 0x1f6   : > { %1427 = vmatpush.bf16.msrb.mxu3 %v1941_v37 }
 0x1f7   : > { %v994_v46 = vmax.f32 %v987_v44, 0.0 }
 0x1f9   : > { %v996_v47 = vpack.c.bf16 %v994_v46, %v993_v45 }
 0x1fa   : > { %1428 = vmatpush.bf16.msrb.mxu3 %v1940_v39 }
 0x1fb   : > { %1074 = vmatmul.bf16.vlgmr.msra.gmra.mxu3 %v996_v47 }
 0x1fc   : > { %v989_v48 = vpop.f32.mrf.mxu2 }
 0x1fd   : > { %v990_v50 = vadd.f32 %v989_v48, %v972_v49 }
 0x1ff   : > { %v995_v52 = vmax.f32 %v990_v50, 0.0 }
 0x201   : > { %v997_v53 = vpack.c.bf16 %v995_v52, %v995_v52  ;;  %v1938_v52 = vld [vmem:[#allocation12 + $0x8] sm:$0xff] }
 0x204   : > { %v991_v51 = vpop.f32.mrf.mxu2 }
 0x205   : > { %v1939_v51 = vld [vmem:[#allocation12 + $0x10] sm:$0xff] }
 0x206   : > { %1429 = vmatpush.bf16.msrb.mxu3 %v1939_v51 }
 0x20a   : > { %1430 = vmatpush.bf16.msrb.mxu3 %v1938_v52 }
 0x20b   : > { %1079 = vmatmul.bf16.gmra.mxu3 %v997_v53  ;;  %v1937_v53 = vld [vmem:[#allocation12] sm:$0xff] }
 0x20e   : > { %1431 = vmatpush.bf16.msrb.mxu3 %v1937_v53 }
 0x27e   : > { %v1075_v4 = vpop.f32.mrf.mxu3 }
 0x27f   : > { %v1076_v5 = vadd.f32 %v2081_v3, %v1075_v4 }
 0x281   : > { %v1084_v6 = vmax.f32 %v1076_v5, 0.0 }
 0x283   : > { %1087 = vst [vmem:[#allocation2] sm:$0xff] %v1084_v6  ;;  %v1090_v10 = vpack.c.bf16 %v1084_v6, %v1084_v6 }
 0x285   : > { %v1098_v13 = vunpack.c.l.b16 %v1090_v10 }
 0x286   : > { %v1077_v8 = vpop.f32.mrf.mxu3 }
 0x287   : > { %v1078_v9 = vadd.f32 %v2081_v3, %v1077_v8 }
 0x289   : > { %v1085_v11 = vmax.f32 %v1078_v9, 0.0 }
 0x28b   : > { %1088 = vst [vmem:[#allocation2 + $0x8] sm:$0xff] %v1085_v11  ;;  %v1091_v12 = vpack.c.bf16 %v1085_v11, %v1085_v11 }
 0x28d   : > { %v1099_v14 = vunpack.c.l.b16 %v1091_v12 }
 0x28e   : > { %v1080_v15 = vpop.f32.mrf.mxu3 }
 0x28f   : > { %v1081_v16 = vadd.f32 %v2081_v3, %v1080_v15  ;;  %v1100_v17 = vpack.c.b16 %v1099_v14, %v1098_v13 }
 0x291   : > { %v1086_v18 = vmax.f32 %v1081_v16, 0.0  ;;  %1248 = vmatmul.bf16.vlgmr.msrb.gmra.mxu0 %v1100_v17 }
 0x292   : > { %v1092_v20 = vld [vmem:[#allocation2 + $0x1] sm:$0xff] }
 0x293   : > { %1089 = vst [vmem:[#allocation2 + $0x10] sm:$0x1] %v1086_v18  ;;  %v1094_v21 = vpack.c.bf16 %v1092_v20, %v1092_v20 }
 0x295   : > { %v1104_v24 = vunpack.c.l.b16 %v1094_v21 }
 0x296   : > { %v1082_v19 = vpop.f32.mrf.mxu3 }
 0x29a   : > { %v1093_v22 = vld [vmem:[#allocation2 + $0x9] sm:$0xff] }
 0x29b   : > { %v1095_v23 = vpack.c.bf16 %v1093_v22, %v1093_v22 }
 0x29d   : > { %v1105_v25 = vunpack.c.l.b16 %v1095_v23 }
 0x29f   : > { %v1106_v26 = vpack.c.b16 %v1105_v25, %v1104_v24 }
 0x2a1   : > { %1262 = vmatmul.bf16.vlgmr.msrb.gmra.mxu1 %v1106_v26 }
 0x30e   : > { %v1249_v38 = vpop.f32.mrf.mxu0 }
 0x30f   : > { %v1250_v43 = vadd.f32 %v2082_v41, %v1249_v38 }
 0x316   : > { %v1251_v42 = vpop.f32.mrf.mxu0 }
 0x317   : > { %v1252_v44 = vadd.f32 %v2082_v41, %v1251_v42 }
 0x31e   : > { %v1263_v40 = vpop.f32.mrf.mxu1 }
 0x31f   : > { %v1264_v45 = vadd.f32 %v1263_v40, %v1250_v43 }
 0x321   : > { %v1268_v48 = vmax.f32 %v1264_v45, 0.0 }
 0x326   : > { %v1265_v46 = vpop.f32.mrf.mxu1 }
 0x327   : > { %v1266_v47 = vadd.f32 %v1265_v46, %v1252_v44 }
 0x329   : > { %v1269_v49 = vmax.f32 %v1266_v47, 0.0 }
 0x32b   : > { %v1270_v50 = vpack.c.bf16 %v1269_v49, %v1268_v48 }
 0x32d   : > { %1347 = vmatmul.bf16.vlgmr.msrb.gmra.mxu2 %v1270_v50 }
 0x3b0   : > { %v1348_v54 = vpop.f32.mrf.mxu2 }
 0x3b1   : > { %v1349_v56 = vadd.f32 %v2083_v55, %v1348_v54 }
 0x3b3   : > { %v1353_v59 = vmax.f32 %v1349_v56, 0.0 }
 0x3b8   : > { %v1350_v57 = vpop.f32.mrf.mxu2 }
 0x3b9   : > { %v1351_v58 = vadd.f32 %v2083_v55, %v1350_v57 }
 0x3bb   : > { %v1354_v60 = vmax.f32 %v1351_v58, 0.0 }
 0x3bd   : > { %v1355_v61 = vpack.c.bf16 %v1354_v60, %v1353_v59 }
 0x3bf   : > { %1432 = vmatmul.bf16.vlgmr.msrb.gmra.mxu3 %v1355_v61 }
 0x442   : > { %v1433_v62 = vpop.f32.mrf.mxu3 }
 0x443   : > { %v1434_v1 = vadd.f32 %v2084_v63, %v1433_v62 }
 0x44a   : > { %v1435_v0 = vpop.f32.mrf.mxu3 }
 0x44b   : > { %v1436_v2 = vadd.f32 %v2084_v63, %v1435_v0 }
 0x44d   : > { %v1949_v3 = vpack.c.bf16 %v1436_v2, %v1434_v1 }
 0x44f   : > { %1950 = vst [vmem:[%s628_s0] sm:$0xff] %v1949_v3  }
 0x450   : > { %2292 = shalt.err (!%p2289_p9)
}
 0x451   : > { %s2370_s27 = smov 64   ;;  %s2371_s16 = smov 4  }
 0x452   : > { %1976 = dma.vmem_to_hbm [thread:$0]  (%p2497_p4), %s1458_s26, 128, %s1460_s20, %s1443_s24, %s2370_s27, %s2370_s27, %s2371_s16  }
 0x453 PF: > { %s2717_s25 = sld [smem:[#allocation23_spill]] }
 0x454   : > { %s2718_s23 = sld [smem:[#allocation20_spill]] }
 0x459   : > { %p2013_p10 = scmp.ge.s32.totalorder %s2717_s25, 2 }
 0x45a   : > { %s1474_s0 = sand.u32 1, %s2718_s23  }
 0x45b   : > { %p1998_p11 = pnand %p2013_p10, %p2504_p8  ;;  %s1475_s29 = scalar_lea.sflag [#allocation5], %s1474_s0 }
 0x45d   : > { %p1999_p12 = pneg %p1998_p11 }
 0x45f   : > { %2334 = dma.done.wait (%p1999_p12), %s1475_s29, 128  }
 0x460   : > { %2336 = vsyncadd (%p1999_p12), %s1475_s29, 4294967168  ;;  %s33_s26 = sadd.s32 1, %s2717_s25   ;;  %s2720_s30 = sld [smem:[#allocation21_spill]] }
 0x461   : > { %p30_p13 = scmp.ge.s32.totalorder %s33_s26, 4   ;;  %s2721_s23 = sld [smem:[#allocation27_spill]] }
 0x462   : > { %s2722_s24 = sld [smem:[#allocation22_spill]]  ;;  %s2724_s21 = smov %s2343_s22 }
 0x463   : > { %s2723_s25 = sld [smem:[#allocation24_spill]]  ;;  %32 = sbr.rel (!%p30_p13) target bundleno = 14 (0xe), region = 146 }
 0x466   : > { %s2725_s22 = smov %s2720_s30 }
 0x468   :  { %1481 = vsyncpa [#allocation4], 1 }
 0x469   :  { %1483 = vsyncpa [#allocation4 + $0x1], 1 }
 0x46a   :  { %1484 = vsyncpa [#allocation7], 1 }
 0x46b   :  { %1485 = vsyncpa [#allocation10], 1 }
 0x46c   :  { %1486 = vsyncpa [#allocation13], 1 }
 0x46d   :  { %1487 = vsyncpa [#allocation5], 1 }
 0x46e   :  { %1489 = vsyncpa [#allocation5 + $0x1], 1 }

</bundles_post_ra>
